<compile_context>
chip_gen: v5e
topology: v5e:2x2
jax: 0.10.0
libtpu: 0.0.40
codegen_flags: <defaults>
</compile_context>

<pallas_src>
import functools

import jax
import jax.numpy as jnp
from jax.experimental import pallas as pl
from jax.experimental.pallas import tpu as pltpu


def _residual_conv_kernel(x_ref, halo_ref, w1_ref, w20_ref, w21_ref, w22_ref,
                          o_ref):
    # x_ref:    (C, TL)     one (batch, L-tile) block; channels on sublanes, L on lanes
    # halo_ref: (C, 2)      x columns just outside the tile:
    #                       [:, 0] = x[:, tile_start-1], [:, 1] = x[:, tile_end]
    #                       (zero at the true sequence edges -> pad=1 semantics)
    # w1_ref:   (Cmid, C)   layer1 1x1-conv weight
    # w2k_ref:  (C, Cmid)   layer2 k=3 conv weight, tap k (transposed)
    # o_ref:    (C, TL)
    x = x_ref[...]                                                    # (C, TL)
    tl = x.shape[1]

    # ---- layer1: 1x1 conv == channel matmul, then ReLU --------------------
    h = jnp.maximum(
        jnp.dot(w1_ref[...], x, preferred_element_type=jnp.float32), 0.0)  # (Cmid, TL)
    hh = jnp.maximum(
        jnp.dot(w1_ref[...], halo_ref[...],
                preferred_element_type=jnp.float32), 0.0)                  # (Cmid, 2)

    # ---- layer2: k=3, pad=1 conv.  out[:, l] = sum_k W2_k @ h[:, l+k-1] ----
    # Each tap is computed on the un-shifted h; results are shifted +/-1 lane
    # with an XLU roll, and the single wrap-around column per tap is replaced
    # by the halo contribution.
    y0 = jnp.dot(w20_ref[...], h, preferred_element_type=jnp.float32)  # wants h[:, l-1]
    y1 = jnp.dot(w21_ref[...], h, preferred_element_type=jnp.float32)  # wants h[:, l]
    y2 = jnp.dot(w22_ref[...], h, preferred_element_type=jnp.float32)  # wants h[:, l+1]

    yh0 = jnp.dot(w20_ref[...], hh,
                  preferred_element_type=jnp.float32)[:, 0:1]  # left halo -> col 0
    yh2 = jnp.dot(w22_ref[...], hh,
                  preferred_element_type=jnp.float32)[:, 1:2]  # right halo -> col TL-1

    lane = jax.lax.broadcasted_iota(jnp.int32, y1.shape, 1)
    y0s = jnp.where(lane == 0, yh0, pltpu.roll(y0, shift=1, axis=1))
    y2s = jnp.where(lane == tl - 1, yh2, pltpu.roll(y2, shift=tl - 1, axis=1))

    z = jnp.maximum(y0s + y1 + y2s, 0.0) + x                  # ReLU then residual add
    o_ref[...] = z.astype(o_ref.dtype)


def _pick_tile_l(L, max_tile):
    """Largest lane-friendly (multiple-of-128) tile that divides L, else full L."""
    if L <= max_tile:
        return L
    for t in (2048, 1024, 512, 256, 128):
        if t <= max_tile and L % t == 0:
            return t
    # TODO(synk): non-128-divisible L is not tiled; falls back to one full-L block.
    return L


def _halo_columns(x, tile_l, num_t):
    """(N, num_t, C, 2) halo columns; zero outside the sequence (Conv1d pad=1)."""
    N, C, L = x.shape
    zero = jnp.zeros((N, C, 1), x.dtype)
    if num_t > 1:
        left_in = x[:, :, tile_l - 1:L - 1:tile_l]          # (N, C, num_t-1)
        right_in = x[:, :, tile_l:L:tile_l]                 # (N, C, num_t-1)
        left = jnp.concatenate([zero, left_in], axis=2)     # (N, C, num_t)
        right = jnp.concatenate([right_in, zero], axis=2)   # (N, C, num_t)
    else:
        left, right = zero, zero
    halo = jnp.stack([left, right], axis=-1)                # (N, C, num_t, 2)
    return jnp.transpose(halo, (0, 2, 1, 3))                # (N, num_t, C, 2)


@functools.partial(jax.jit, static_argnames=("max_tile",))
def residual_conv(x, w1, w2, *, max_tile=1024):
    """x: (N, C, L); w1: (Cmid, C, 1); w2: (C, Cmid, 3).  Returns (N, C, L)."""
    N, C, L = x.shape
    Cmid = w1.shape[0]

    w1m = w1[:, :, 0]                     # (Cmid, C)
    w20 = w2[:, :, 0]                     # (C, Cmid) per-tap weights
    w21 = w2[:, :, 1]
    w22 = w2[:, :, 2]

    tile_l = _pick_tile_l(L, max_tile)
    num_t = L // tile_l
    halo = _halo_columns(x, tile_l, num_t)

    return pl.pallas_call(
        _residual_conv_kernel,
        out_shape=jax.ShapeDtypeStruct((N, C, L), x.dtype),
        grid=(N, num_t),
        in_specs=[
            pl.BlockSpec((None, C, tile_l), lambda n, t: (n, 0, t)),      # x tile
            pl.BlockSpec((None, None, C, 2), lambda n, t: (n, t, 0, 0)),  # halo cols
            pl.BlockSpec((Cmid, C), lambda n, t: (0, 0)),                 # w1 (fetched once)
            pl.BlockSpec((C, Cmid), lambda n, t: (0, 0)),                 # w2 tap 0
            pl.BlockSpec((C, Cmid), lambda n, t: (0, 0)),                 # w2 tap 1
            pl.BlockSpec((C, Cmid), lambda n, t: (0, 0)),                 # w2 tap 2
        ],
        out_specs=pl.BlockSpec((None, C, tile_l), lambda n, t: (n, 0, t)),
        compiler_params=pltpu.CompilerParams(
            dimension_semantics=("parallel", "parallel")),
    )(x, halo, w1m, w20, w21, w22)


def _reference(x, w1, w2):
    """Pure-JAX reference with PyTorch Conv1d semantics in NCL layout."""
    h = jnp.maximum(jnp.einsum('ncl,mc->nml', x, w1[:, :, 0]), 0.0)   # (N, Cmid, L)
    hp = jnp.pad(h, ((0, 0), (0, 0), (1, 1)))
    L = x.shape[2]
    y = sum(jnp.einsum('ncl,oc->nol', hp[:, :, k:k + L], w2[:, :, k])
            for k in range(3))
    return jnp.maximum(y, 0.0) + x


if __name__ == "__main__":
    key = jax.random.PRNGKey(0)

    configs = [
        # (N, C, L, max_tile): first config forces 2 L-tiles (exercises the
        # halo path); second is a single 128-lane tile.
        (2, 8, 256, 128),
        (1, 16, 128, 1024),
    ]
    for (N, C, L, max_tile) in configs:
        key, k_x, k_w1, k_w2 = jax.random.split(key, 4)
        Cmid = C // 2
        x = jax.random.normal(k_x, (N, C, L), dtype=jnp.float32)
        w1 = jax.random.normal(k_w1, (Cmid, C, 1), dtype=jnp.float32) * 0.2
        w2 = jax.random.normal(k_w2, (C, Cmid, 3), dtype=jnp.float32) * 0.2

        out = jax.block_until_ready(residual_conv(x, w1, w2, max_tile=max_tile))
        ref = _reference(x, w1, w2)
        assert out.shape == (N, C, L)
        assert jnp.allclose(out, ref, atol=1e-4, rtol=1e-4), f"mismatch at {(N, C, L)}"

    print("KERNEL_OK")
</pallas_src>

<mosaic_0001>
module attributes {stable_mosaic.version = 11 : i64} {
  func.func @_residual_conv_kernel(%arg0: i32, %arg1: i32, %arg2: memref<1x8x128xf32, #tpu.memory_space<vmem>>, %arg3: memref<1x1x8x2xf32, #tpu.memory_space<vmem>>, %arg4: memref<4x8xf32, #tpu.memory_space<vmem>>, %arg5: memref<8x4xf32, #tpu.memory_space<vmem>>, %arg6: memref<8x4xf32, #tpu.memory_space<vmem>>, %arg7: memref<8x4xf32, #tpu.memory_space<vmem>>, %arg8: memref<1x8x128xf32, #tpu.memory_space<vmem>>) attributes {dimension_semantics = [#tpu.dimension_semantics<parallel>, #tpu.dimension_semantics<parallel>], iteration_bounds = array<i64: 2, 2>, scalar_prefetch = 0 : i64, scratch_operands = 0 : i64, tpu.core_type = #tpu.core_type<tc>, window_params = [{transform_indices = @transform_0, window_bounds = array<i64: 1, 8, 128>}, {transform_indices = @transform_1, window_bounds = array<i64: 1, 1, 8, 2>}, {pipeline_mode = #tpu.pipeline_mode<synchronous>, transform_indices = @transform_2, window_bounds = array<i64: 4, 8>}, {pipeline_mode = #tpu.pipeline_mode<synchronous>, transform_indices = @transform_3, window_bounds = array<i64: 8, 4>}, {pipeline_mode = #tpu.pipeline_mode<synchronous>, transform_indices = @transform_4, window_bounds = array<i64: 8, 4>}, {pipeline_mode = #tpu.pipeline_mode<synchronous>, transform_indices = @transform_5, window_bounds = array<i64: 8, 4>}, {transform_indices = @transform_6, window_bounds = array<i64: 1, 8, 128>}]} {
    %c0 = arith.constant 0 : index
    %c0_0 = arith.constant 0 : index
    %c0_1 = arith.constant 0 : index
    %0 = vector.load %arg2[%c0, %c0_0, %c0_1] : memref<1x8x128xf32, #tpu.memory_space<vmem>>, vector<1x8x128xf32>
    %1 = vector.shape_cast %0 : vector<1x8x128xf32> to vector<8x128xf32>
    %c0_2 = arith.constant 0 : index
    %c0_3 = arith.constant 0 : index
    %2 = vector.load %arg4[%c0_2, %c0_3] : memref<4x8xf32, #tpu.memory_space<vmem>>, vector<4x8xf32>
    %cst = arith.constant dense<0.000000e+00> : vector<4x128xf32>
    %3 = tpu.matmul %2, %1, %cst {dimension_numbers = #tpu.dot_dimension_numbers<[1], [0], [0], [1], [0, 0, 1, 1], [], []>} : vector<4x8xf32>, vector<8x128xf32>, vector<4x128xf32> -> vector<4x128xf32>
    %cst_4 = arith.constant 0.000000e+00 : f32
    %4 = vector.broadcast %cst_4 : f32 to vector<4x128xf32>
    %5 = arith.maximumf %3, %4 : vector<4x128xf32>
    %c0_5 = arith.constant 0 : index
    %c0_6 = arith.constant 0 : index
    %6 = vector.load %arg4[%c0_5, %c0_6] : memref<4x8xf32, #tpu.memory_space<vmem>>, vector<4x8xf32>
    %c0_7 = arith.constant 0 : index
    %c0_8 = arith.constant 0 : index
    %c0_9 = arith.constant 0 : index
    %c0_10 = arith.constant 0 : index
    %7 = vector.load %arg3[%c0_7, %c0_8, %c0_9, %c0_10] : memref<1x1x8x2xf32, #tpu.memory_space<vmem>>, vector<1x1x8x2xf32>
    %8 = vector.shape_cast %7 : vector<1x1x8x2xf32> to vector<8x2xf32>
    %cst_11 = arith.constant dense<0.000000e+00> : vector<4x2xf32>
    %9 = tpu.matmul %6, %8, %cst_11 {dimension_numbers = #tpu.dot_dimension_numbers<[1], [0], [0], [1], [0, 0, 1, 1], [], []>} : vector<4x8xf32>, vector<8x2xf32>, vector<4x2xf32> -> vector<4x2xf32>
    %cst_12 = arith.constant 0.000000e+00 : f32
    %10 = vector.broadcast %cst_12 : f32 to vector<4x2xf32>
    %11 = arith.maximumf %9, %10 : vector<4x2xf32>
    %c0_13 = arith.constant 0 : index
    %c0_14 = arith.constant 0 : index
    %12 = vector.load %arg5[%c0_13, %c0_14] : memref<8x4xf32, #tpu.memory_space<vmem>>, vector<8x4xf32>
    %cst_15 = arith.constant dense<0.000000e+00> : vector<8x128xf32>
    %13 = tpu.matmul %12, %5, %cst_15 {dimension_numbers = #tpu.dot_dimension_numbers<[1], [0], [0], [1], [0, 0, 1, 1], [], []>} : vector<8x4xf32>, vector<4x128xf32>, vector<8x128xf32> -> vector<8x128xf32>
    %c0_16 = arith.constant 0 : index
    %c0_17 = arith.constant 0 : index
    %14 = vector.load %arg6[%c0_16, %c0_17] : memref<8x4xf32, #tpu.memory_space<vmem>>, vector<8x4xf32>
    %cst_18 = arith.constant dense<0.000000e+00> : vector<8x128xf32>
    %15 = tpu.matmul %14, %5, %cst_18 {dimension_numbers = #tpu.dot_dimension_numbers<[1], [0], [0], [1], [0, 0, 1, 1], [], []>} : vector<8x4xf32>, vector<4x128xf32>, vector<8x128xf32> -> vector<8x128xf32>
    %c0_19 = arith.constant 0 : index
    %c0_20 = arith.constant 0 : index
    %16 = vector.load %arg7[%c0_19, %c0_20] : memref<8x4xf32, #tpu.memory_space<vmem>>, vector<8x4xf32>
    %cst_21 = arith.constant dense<0.000000e+00> : vector<8x128xf32>
    %17 = tpu.matmul %16, %5, %cst_21 {dimension_numbers = #tpu.dot_dimension_numbers<[1], [0], [0], [1], [0, 0, 1, 1], [], []>} : vector<8x4xf32>, vector<4x128xf32>, vector<8x128xf32> -> vector<8x128xf32>
    %c0_22 = arith.constant 0 : index
    %c0_23 = arith.constant 0 : index
    %18 = vector.load %arg5[%c0_22, %c0_23] : memref<8x4xf32, #tpu.memory_space<vmem>>, vector<8x4xf32>
    %cst_24 = arith.constant dense<0.000000e+00> : vector<8x2xf32>
    %19 = tpu.matmul %18, %11, %cst_24 {dimension_numbers = #tpu.dot_dimension_numbers<[1], [0], [0], [1], [0, 0, 1, 1], [], []>} : vector<8x4xf32>, vector<4x2xf32>, vector<8x2xf32> -> vector<8x2xf32>
    %20 = vector.extract_strided_slice %19 {offsets = [0, 0], sizes = [8, 1], strides = [1, 1]} : vector<8x2xf32> to vector<8x1xf32>
    %c0_25 = arith.constant 0 : index
    %c0_26 = arith.constant 0 : index
    %21 = vector.load %arg7[%c0_25, %c0_26] : memref<8x4xf32, #tpu.memory_space<vmem>>, vector<8x4xf32>
    %cst_27 = arith.constant dense<0.000000e+00> : vector<8x2xf32>
    %22 = tpu.matmul %21, %11, %cst_27 {dimension_numbers = #tpu.dot_dimension_numbers<[1], [0], [0], [1], [0, 0, 1, 1], [], []>} : vector<8x4xf32>, vector<4x2xf32>, vector<8x2xf32> -> vector<8x2xf32>
    %23 = vector.extract_strided_slice %22 {offsets = [0, 1], sizes = [8, 1], strides = [1, 1]} : vector<8x2xf32> to vector<8x1xf32>
    %24 = tpu.iota {dimensions = array<i32: 1>} : vector<8x128xi32>
    %c0_i32 = arith.constant 0 : i32
    %25 = vector.broadcast %c0_i32 : i32 to vector<8x128xi32>
    %26 = arith.cmpi eq, %24, %25 : vector<8x128xi32>
    %c1_i32 = arith.constant 1 : i32
    %27 = tpu.dynamic_rotate %13 by %c1_i32 dim 1 : vector<8x128xf32>, i32 -> vector<8x128xf32>
    %28 = vector.shape_cast %20 : vector<8x1xf32> to vector<8x1xf32>
    %29 = vector.broadcast %28 : vector<8x1xf32> to vector<8x128xf32>
    %30 = arith.select %26, %29, %27 : vector<8x128xi1>, vector<8x128xf32>
    %c127_i32 = arith.constant 127 : i32
    %31 = vector.broadcast %c127_i32 : i32 to vector<8x128xi32>
    %32 = arith.cmpi eq, %24, %31 : vector<8x128xi32>
    %c127_i32_28 = arith.constant 127 : i32
    %33 = tpu.dynamic_rotate %17 by %c127_i32_28 dim 1 : vector<8x128xf32>, i32 -> vector<8x128xf32>
    %34 = vector.shape_cast %23 : vector<8x1xf32> to vector<8x1xf32>
    %35 = vector.broadcast %34 : vector<8x1xf32> to vector<8x128xf32>
    %36 = arith.select %32, %35, %33 : vector<8x128xi1>, vector<8x128xf32>
    %37 = arith.addf %30, %15 : vector<8x128xf32>
    %38 = arith.addf %37, %36 : vector<8x128xf32>
    %cst_29 = arith.constant 0.000000e+00 : f32
    %39 = vector.broadcast %cst_29 : f32 to vector<8x128xf32>
    %40 = arith.maximumf %38, %39 : vector<8x128xf32>
    %41 = arith.addf %40, %1 : vector<8x128xf32>
    %c0_30 = arith.constant 0 : index
    %c0_31 = arith.constant 0 : index
    %c0_32 = arith.constant 0 : index
    %42 = vector.load %arg8[%c0_30, %c0_31, %c0_32] : memref<1x8x128xf32, #tpu.memory_space<vmem>>, vector<1x8x128xf32>
    %43 = vector.shape_cast %42 : vector<1x8x128xf32> to vector<8x128xf32>
    %44 = vector.shape_cast %41 : vector<8x128xf32> to vector<1x8x128xf32>
    tpu.vector_store %arg8[%c0_30, %c0_31, %c0_32], %44 {strides = array<i32>} : memref<1x8x128xf32, #tpu.memory_space<vmem>>, vector<1x8x128xf32>,
    return
  }
  func.func @transform_0(%arg0: i32, %arg1: i32) -> (i32, i32, i32) {
    %c0_i32 = arith.constant 0 : i32
    %c0_i32_0 = arith.constant 0 : i32
    return %arg0, %c0_i32, %arg1 : i32, i32, i32
  }
  func.func @transform_1(%arg0: i32, %arg1: i32) -> (i32, i32, i32, i32) {
    %c0_i32 = arith.constant 0 : i32
    %c0_i32_0 = arith.constant 0 : i32
    %c0_i32_1 = arith.constant 0 : i32
    return %arg0, %arg1, %c0_i32, %c0_i32_0 : i32, i32, i32, i32
  }
  func.func @transform_2(%arg0: i32, %arg1: i32) -> (i32, i32) {
    %c0_i32 = arith.constant 0 : i32
    %c0_i32_0 = arith.constant 0 : i32
    %c0_i32_1 = arith.constant 0 : i32
    return %c0_i32, %c0_i32_0 : i32, i32
  }
  func.func @transform_3(%arg0: i32, %arg1: i32) -> (i32, i32) {
    %c0_i32 = arith.constant 0 : i32
    %c0_i32_0 = arith.constant 0 : i32
    %c0_i32_1 = arith.constant 0 : i32
    return %c0_i32, %c0_i32_0 : i32, i32
  }
  func.func @transform_4(%arg0: i32, %arg1: i32) -> (i32, i32) {
    %c0_i32 = arith.constant 0 : i32
    %c0_i32_0 = arith.constant 0 : i32
    %c0_i32_1 = arith.constant 0 : i32
    return %c0_i32, %c0_i32_0 : i32, i32
  }
  func.func @transform_5(%arg0: i32, %arg1: i32) -> (i32, i32) {
    %c0_i32 = arith.constant 0 : i32
    %c0_i32_0 = arith.constant 0 : i32
    %c0_i32_1 = arith.constant 0 : i32
    return %c0_i32, %c0_i32_0 : i32, i32
  }
  func.func @transform_6(%arg0: i32, %arg1: i32) -> (i32, i32, i32) {
    %c0_i32 = arith.constant 0 : i32
    %c0_i32_0 = arith.constant 0 : i32
    return %arg0, %c0_i32, %arg1 : i32, i32, i32
  }
}

</mosaic_0001>

<bundles_post_ra>
// kernel: residual_conv.1
= control target key start
LH: loop header
LB: loop body
LE: loop exit
PB: predicated region body
PF: predicated region fallthrough
CT: control target
= control target key end

     0   :  { %11 = vsyncpa [#allocation3], 0  ;;  %s995_s0 = inlined_call_operand.vmem [shape: f32[2,8,256], index: 0, kind: input, shape index: {}]   ;;  %s996_s1 = inlined_call_operand.vmem [shape: f32[2,2,8,2], index: 1, kind: input, shape index: {}]   ;;  %s997_s2 = inlined_call_operand.vmem [shape: f32[4,8], index: 2, kind: input, shape index: {}]   ;;  %s998_s3 = inlined_call_operand.vmem [shape: f32[8,4], index: 3, kind: input, shape index: {}]   ;;  %s999_s4 = inlined_call_operand.vmem [shape: f32[8,4], index: 4, kind: input, shape index: {}]   ;;  %s1000_s5 = inlined_call_operand.vmem [shape: f32[8,4], index: 5, kind: input, shape index: {}]   ;;  %s1001_s6 = inlined_call_operand.hbm [shape: f32[2,8,256], index: 6, kind: output, shape index: {}]  }
   0x1   :  { %13 = vsyncpa [#allocation3 + $0x1], 0  ;;  %s854_s21 = smov 0   ;;  %s856_s22 = smov 0  }
   0x2   :  { %s858_s23 = smov 0   ;;  %s860_s24 = smov 0  }
   0x3   :  { %s862_s25 = smov 0   ;;  %s864_s26 = smov 0  }
   0x4   :  { %s866_s27 = smov 0   ;;  %s868_s28 = smov 0  }
   0x5 LB: > { %s614_s29 = sadd.s32 4294967295, %s813_s28   ;;  %s615_s30 = sadd.s32 4294967294, %s813_s28   ;;  %s813_s28 = sphi %s868_s28, %s19_s28   ;;  %s809_s27 = sphi %s866_s27, %s1016_s27   ;;  %s805_s26 = sphi %s864_s26, %s1015_s26   ;;  %s801_s25 = sphi %s862_s25, %s1014_s25   ;;  %s797_s24 = sphi %s860_s24, %s1013_s24   ;;  %s793_s23 = sphi %s858_s23, %s1012_s23   ;;  %s789_s22 = sphi %s856_s22, %s1011_s22   ;;  %s785_s21 = sphi %s854_s21, %s1010_s21  }
   0x6   : > { %s28_s7 = sadd.s32 1, %s805_s26  ;;  %s31_s8 = sadd.s32 1, %s809_s27 }
   0x7   : > { %p29_p0 = scmp.ge.s32.totalorder %s28_s7, 2  ;;  %p190_p1 = scmp.ne.s32.totalorder %s793_s23, %s789_s22 }
   0x8   : > { %p191_p2 = scmp.eq.s32.totalorder %s614_s29, 3  ;;  %p196_p5 = scmp.ne.s32.totalorder %s789_s22, %s785_s21 }
   0x9   : > { %s1018_s7 = smov (%p29_p0, %s28_s7), 0  ;;  %s1020_s8 = smov (!%p29_p0, %s31_s8), %s809_s27 }
   0xa   : > { %1004 = sst [smem:[#allocation5_spill]] %s1018_s7  ;;  %s176_s9 = ssub.s32 %s805_s26, %s1018_s7 }
   0xb   : > { %p905_p3 = por %p191_p2, %p190_p1  ;;  %p33_p4 = scmp.ge.s32.totalorder %s1020_s8, 2 }
   0xc   : > { %p197_p6 = scmp.eq.s32.totalorder %s615_s30, 3  ;;  %p618_p7 = scmp.ge.s32.totalorder %s813_s28, 1 }
   0xd   : > { %s1022_s8 = smov (%p33_p4, %s1020_s8), 0  ;;  %p249_p9 = scmp.lt.s32.totalorder %s813_s28, 5 }
   0xe   : > { %1006 = sst [smem:[#allocation6_spill]] %s1022_s8  ;;  %p914_p8 = por %p197_p6, %p196_p5 }
   0xf   : > { %s175_s12 = ssub.s32 %s809_s27, %s1022_s8  ;;  %s180_s13 = sadd.s32 1, %s793_s23 }
  0x10   : > { %s177_s14 = sor.u32 %s176_s9, %s175_s12  ;;  %p250_p10 = pnand %p618_p7, %p249_p9 }
  0x11   : > { %p178_p11 = scmp.eq.s32.totalorder %s177_s14, 0  ;;  %p290_p12 = scmp.lt.s32.totalorder (!%p250_p10), %s801_s25, 1 }
  0x12   : > { %253 = sbr.rel (%p250_p10) target bundleno = 427 (0x1ab), region = 44  ;;  %p292_p13 = scmp.lt.s32.totalorder (!%p250_p10), %s797_s24, 1 }
  0x13   : > { %s923_s15 = scalar_select %p178_p11, %s793_s23, %s180_s13  }
  0x14   : > { %s818_s29 = smov (!%p250_p10), 1   ;;  %s637_s30 = sshll.u32 (!%p250_p10), %s801_s25, 1 }
  0x15   : > { %s511_s12 = sadd.s32 (!%p250_p10), %s797_s24, %s637_s30 }
  0x16   : > { %s638_s13 = sshll.u32 (!%p250_p10), %s511_s12, 3  ;;  %s739_s12 = scalar_lea.hbm (!%p250_p10), %s1001_s6, 32 }
  0x17   : > { %s291_s16 = scalar_select %p290_p12, %s801_s25, 1  ;;  %v307_v0 = vld [vmem:[%s997_s2] sm:$0xf]  ;;  %vm308_vm0 = vcmask 64512   ;;  %vm360_vm1 = vcmask 1043456   ;;  %vm356_vm2 = vcmask 31744   ;;  %v475_v17 = vlaneseq }
  0x18   : > { %s293_s17 = scalar_select %p292_p13, %s797_s24, 1  ;;  %v355_v7 = vld [vmem:[%s998_s3] sm:$0xff]  ;;  %v815_v10 = vmov 1   ;;  %v816_v11 = vmov 0  }
  0x19   : > { %s620_s18 = sshll.u32 %s291_s16, 1  ;;  %v408_v8 = vld [vmem:[%s1000_s5] sm:$0xff]  ;;  %717 = vset.pattern.permute.xlu1 %v815_v10  ;;  %716 = vset.pattern.permute.xlu0 %v816_v11  ;;  %v476_v19 = vand.u32 127, %v475_v17  ;;  %s513_s8 = scalar_lea.hbm %s1001_s6, %s638_s13 }
  0x1a   : > { %s295_s19 = sadd.s32 %s620_s18, %s293_s17  ;;  %v384_v9 = vld [vmem:[%s999_s4] sm:$0xff] }
  0x1b   : > { %s621_s20 = sshll.u32 %s295_s19, 3  ;;  %vm477_vm3 = vcmp.eq.s32.totalorder %v476_v19, 0  ;;  %vm486_vm4 = vcmp.eq.s32.totalorder %v476_v19, 127 }
  0x1c   : > { %s297_s9 = scalar_lea.vmem %s995_s0, %s621_s20  ;;  %s305_s7 = scalar_lea.vmem %s996_s1, %s621_s20 }
  0x1d   : > { %v938_v1 = vld [vmem:[%s297_s9] sm:$0xff]  ;;  %s817_s20 = smov 127   ;;  %s287_s9 = sand.u32 1, %s789_s22  }
  0x1e   : > { %v333_v2 = vld [vmem:[%s305_s7] sm:$0xff]  ;;  %327 = vmatpush.msra.mxu0 %v938_v1  ;;  %s619_s14 = sshll.u32 %s287_s9, 3  ;;  %s517_s7 = sshll.u32 %s513_s8, 4  ;;  %s518_s7 = int_to_ptr.hbm [resolvable:$true] %s517_s7 }
  0x1f   : > { %349 = vmatpush.msra.mxu1 %v333_v2  ;;  %624 = vmatmul.msk.f32.vlgmr.msra.gmra.mxu0 %vm308_vm0, %v307_v0  ;;  %s289_s25 = scalar_lea.vmem [#allocation2], %s619_s14  ;;  %s501_s24 = scalar_lea.sflag [#allocation3], %s287_s9 }
  0x20   : > { %625 = vmatmul.msk.f32.vlgmr.msra.gmra.mxu1 %vm308_vm0, %v307_v0  ;;  %s515_s18 = sshll.u32 %s289_s25, 4  ;;  %s733_s19 = sshra.s32 %s518_s7, 4  ;;  %s516_s18 = int_to_ptr.vmem [resolvable:$true] %s515_s18  ;;  %s734_s19 = int_to_ptr.hbm [resolvable:$true] %s733_s19 }
  0x21   : > { %p740_p4 = scmp.lt.s32.totalorder %s734_s19, %s1001_s6 }
  0x9c   : > { %v329_v3 = vpop.f32.mrf.mxu0 }
  0x9d   : > { %v351_v4 = vpop.f32.mrf.mxu1  ;;  %v332_v5 = vmax.f32 %v329_v3, 0.0 }
  0x9e   : > { %v354_v6 = vmax.f32 %v351_v4, 0.0 }
  0x9f   : > { %626 = vmatpush.msk.msra.mxu2 %vm360_vm1, %v332_v5  ;;  %628 = vmatpush.msk.msra.mxu3 %vm360_vm1, %v332_v5 }
  0xa0   : > { %630 = vmatpush.msk.msrb.mxu0 %vm360_vm1, %v332_v5  ;;  %627 = vmatmul.msk.f32.vlgmr.msra.gmra.mxu2 %vm356_vm2, %v355_v7 }
  0xa1   : > { %632 = vmatpush.msk.msrb.mxu1 %vm360_vm1, %v354_v6  ;;  %634 = vmatpush.msk.msrb.mxu2 %vm360_vm1, %v354_v6 }
  0xa2   : > { %631 = vmatmul.msk.f32.vlgmr.msrb.gmra.mxu0 %vm356_vm2, %v408_v8  ;;  %633 = vmatmul.msk.f32.vlgmr.msrb.gmra.mxu1 %vm356_vm2, %v355_v7 }
  0xa3   : > { %629 = vmatmul.msk.f32.vlgmr.msra.gmra.mxu3 %vm356_vm2, %v384_v9 }
  0xa8   : > { %635 = vmatmul.msk.f32.vlgmr.msrb.gmra.mxu2 %vm356_vm2, %v408_v8 }
 0x11f   : > { %v429_v12 = vpop.f32.mrf.mxu0  ;;  %v452_v14 = vpop.f32.mrf.mxu1 }
 0x120   : > { %487 = vrot.lane.b32.xlu1 %v429_v12, %s817_s20  ;;  %s735_s20 = scalar_lea.hbm %s734_s19, 8 }
 0x121   : > { %p736_p0 = scmp.ne.s32.totalorder %s734_s19, %s735_s20  ;;  %p741_p5 = scmp.lt.s32.totalorder %s739_s12, %s735_s20 }
 0x123   : > { %v381_v13 = vpop.f32.mrf.mxu2  ;;  %p737_p1 = pnand %p736_p0, %p905_p3  ;;  %p742_p6 = por %p741_p5, %p740_p4 }
 0x124   : > { %478 = vrot.lane.b32.xlu0 %v381_v13, %s818_s29 }
 0x125   : > { %p738_p2 = pneg %p737_p1 }
 0x126   : > { %v405_v20 = vpop.f32.mrf.mxu3 }
 0x127   : > { %p743_p7 = pnand %p742_p6, %p738_p2 }
 0x12b   : > { %v472_v15 = vpop.f32.mrf.mxu2 }
 0x12c   : > { %482 = vperm.xlu0 %716, %v452_v14   ;;  %491 = vperm.xlu1 %717, %v472_v15  }
 0x134   : > { %718 = vset.pattern.permute.xlu0 %v815_v10 }
 0x192   : > { %v488_v16 = vpop.permute.xlu1 %487 }
 0x196   : > { %v479_v18 = vpop.permute.xlu0 %478 }
 0x19e   : > { %v483_v21 = vpop.permute.xlu0 %482  ;;  %v492_v22 = vpop.permute.xlu1 %491 }
 0x19f   : > { %v485_v23 = vsel %vm477_vm3, %v483_v21, %v479_v18  ;;  %v494_v25 = vsel %vm486_vm4, %v492_v22, %v488_v16 }
 0x1a0   : > { %v495_v24 = vadd.f32 %v485_v23, %v405_v20 }
 0x1a2   : > { %v496_v26 = vadd.f32 %v495_v24, %v494_v25 }
 0x1a4   : > { %v497_v27 = vmax.f32 %v496_v26, 0.0 }
 0x1a6   : > { %v498_v28 = vadd.f32 %v497_v27, %v938_v1 }
 0x1a8   : > { %499 = vst [vmem:[%s289_s25] sm:$0xff] %v498_v28 }
 0x1a9   : > { %746 = shalt.err (!%p743_p7)
}
 0x1aa   : > { %641 = dma.vmem_to_hbm [thread:$0]  (%p905_p3), %s516_s18, 128, %s518_s7, %s501_s24  }
 0x1ab PF: > { %p647_p9 = scmp.ge.s32.totalorder %s813_s28, 2  ;;  %s529_s9 = sand.u32 1, %s785_s21  }
 0x1ac   : > { %s530_s16 = scalar_lea.sflag [#allocation3], %s529_s9 }
 0x1ad   : > { %p644_p10 = pnand %p647_p9, %p914_p8 }
 0x1af   : > { %p645_p11 = pneg %p644_p10 }
 0x1b1   : > { %780 = dma.done.wait (%p645_p11), %s530_s16, 128  }
 0x1b2   : > { %782 = vsyncadd (%p645_p11), %s530_s16, 4294967168  ;;  %s19_s28 = sadd.s32 1, %s813_s28   ;;  %s1008_s10 = sld [smem:[#allocation5_spill]] }
 0x1b3   : > { %p16_p12 = scmp.ge.s32.totalorder %s19_s28, 6   ;;  %s1009_s17 = sld [smem:[#allocation6_spill]] }
 0x1b4   : > { %s1010_s21 = smov %s789_s22  ;;  %s1011_s22 = smov %s793_s23 }
 0x1b5   : > { %s1012_s23 = smov %s923_s15  ;;  %s1013_s24 = smov %s805_s26 }
 0x1b6   : > { %s1014_s25 = smov %s809_s27  ;;  %18 = sbr.rel (!%p16_p12) target bundleno = 5 (0x5), region = 82 }
 0x1b8   : > { %s1015_s26 = smov %s1008_s10 }
 0x1b9   : > { %s1016_s27 = smov %s1009_s17 }
 0x1bb   :  { %536 = vsyncpa [#allocation3], 1 }
 0x1bc   :  { %538 = vsyncpa [#allocation3 + $0x1], 1 }

</bundles_post_ra>
